<compile_context>
chip_gen: v7x
topology: tpu7x:2x2x1
jax: 0.10.0
libtpu: 0.0.40
codegen_flags: <defaults>
</compile_context>

<pallas_src>
import functools

import jax
import jax.numpy as jnp
from jax import lax
from jax.experimental import pallas as pl
from jax.experimental.pallas import tpu as pltpu

_LANES = 128
_SUBLANES = 8
_TILE_ELEMS = _SUBLANES * _LANES          # 1024
_TARGET_BLOCK_ROWS = 4096                 # 2 MiB f32 per input tile


def _static_pow(x, e):
    """x**e for a static Python exponent.

    Small positive integer exponents become VPU multiplies (exponentiation by
    squaring) instead of the EUP exp(e*log(x)) pair emitted by jnp.power with
    a float exponent.
    """
    ef = float(e)
    if ef == 0.0:
        return jnp.ones_like(x)
    if ef.is_integer() and 1.0 <= ef <= 16.0:
        n = int(ef)
        result = None
        base = x
        while n:
            if n & 1:
                result = base if result is None else result * base
            n >>= 1
            if n:
                base = base * base
        return result
    return jnp.power(x, ef)


def _center_loss_kernel(p_ref, g_ref, out_ref, *, alpha, beta, eps,
                        block_rows, valid_rows_last, needs_row_mask):
    j = pl.program_id(0)

    @pl.when(j == 0)
    def _():
        out_ref[...] = jnp.zeros_like(out_ref)

    def partial_sum(v):
        # (block_rows, 128) -> (8, 128): only splits the sublane-block dim, so
        # this is pure VPU vreg adds; the single tiny cross-lane reduction
        # happens once in the wrapper epilogue.
        return v.reshape(block_rows // _SUBLANES, _SUBLANES, _LANES).sum(axis=0)

    def accumulate(p, g):
        pos_b = g == 1.0
        pos_f = pos_b.astype(jnp.float32)      # reused as weight AND count
        # Single log per element: pos lanes need log(p + eps), neg lanes need
        # log(1 - p + eps); the two sets are mutually exclusive.
        logx = jnp.log(jnp.where(pos_b, p, 1.0 - p) + eps)

        pos_w = pos_f if alpha == 0.0 else pos_f * _static_pow(1.0 - p, alpha)
        if beta != 0.0:
            neg_w = jnp.where(g < 1.0, _static_pow(1.0 - g, beta), 0.0)
        else:
            neg_w = (g < 1.0).astype(jnp.float32)
        if alpha != 0.0:
            neg_w = neg_w * _static_pow(p, alpha)

        # pos_loss + neg_loss folded into one accumulator: the final loss only
        # ever uses their sum (when num_pos == 0, pos_loss is 0 anyway).
        out_ref[0] += partial_sum(logx * (pos_w + neg_w))
        out_ref[1] += partial_sum(pos_f)

    if needs_row_mask:
        last = pl.num_programs(0) - 1

        @pl.when(j != last)
        def _():
            accumulate(p_ref[...].astype(jnp.float32),
                       g_ref[...].astype(jnp.float32))

        @pl.when(j == last)
        def _():
            # Only the final (partial) block pays for a mask.  Rows past the
            # array end hold garbage; sanitize them with a neutral (p, g) =
            # (0.5, 2.0): g > 1 hits neither the pos nor the neg branch and
            # p = 0.5 keeps the log finite.
            row = lax.broadcasted_iota(jnp.int32, (block_rows, _LANES), 0)
            valid = row < valid_rows_last
            accumulate(jnp.where(valid, p_ref[...].astype(jnp.float32), 0.5),
                       jnp.where(valid, g_ref[...].astype(jnp.float32), 2.0))
    else:
        accumulate(p_ref[...].astype(jnp.float32),
                   g_ref[...].astype(jnp.float32))


def _tail_sums(p, g, alpha, beta, eps):
    """Pure-jnp (loss_sum, num_pos) for the ragged element tail (< 1024 elems)."""
    p = p.astype(jnp.float32)
    g = g.astype(jnp.float32)
    pos_b = g == 1.0
    pos_f = pos_b.astype(jnp.float32)
    logx = jnp.log(jnp.where(pos_b, p, 1.0 - p) + eps)
    pos_w = pos_f if float(alpha) == 0.0 else pos_f * _static_pow(1.0 - p, alpha)
    if float(beta) != 0.0:
        neg_w = jnp.where(g < 1.0, _static_pow(1.0 - g, beta), 0.0)
    else:
        neg_w = (g < 1.0).astype(jnp.float32)
    if float(alpha) != 0.0:
        neg_w = neg_w * _static_pow(p, alpha)
    return jnp.sum(logx * (pos_w + neg_w)), jnp.sum(pos_f)


def center_loss(preds, gt, *, alpha=0, beta=4, eps=1e-8, block_rows=None):
    """Pallas implementation of CenterLoss.forward(preds, gt).

    Accepts f32 or bf16 heatmaps (feed bf16 directly to halve HBM traffic;
    the kernel upcasts per tile).  `block_rows` is exposed only for testing.
    """
    p = preds.reshape(-1)
    g = gt.reshape(-1)
    n = p.shape[0]

    rem = n % _TILE_ELEMS
    n_main = n - rem

    loss_sum = jnp.float32(0.0)
    num_pos = jnp.float32(0.0)

    if n_main:
        rows = n_main // _LANES                       # multiple of 8
        p2 = (p[:n_main] if rem else p).reshape(rows, _LANES)
        g2 = (g[:n_main] if rem else g).reshape(rows, _LANES)

        br = _TARGET_BLOCK_ROWS if block_rows is None else block_rows
        br = min(br, rows)
        br = max(_SUBLANES, (br // _SUBLANES) * _SUBLANES)
        num_blocks = pl.cdiv(rows, br)
        valid_rows_last = rows - (num_blocks - 1) * br
        needs_row_mask = valid_rows_last != br

        kernel = functools.partial(
            _center_loss_kernel,
            alpha=float(alpha), beta=float(beta), eps=float(eps),
            block_rows=br, valid_rows_last=valid_rows_last,
            needs_row_mask=needs_row_mask,
        )

        partials = pl.pallas_call(
            kernel,
            out_shape=jax.ShapeDtypeStruct((2, _SUBLANES, _LANES), jnp.float32),
            grid=(num_blocks,),
            in_specs=[
                pl.BlockSpec((br, _LANES), lambda j: (j, 0)),
                pl.BlockSpec((br, _LANES), lambda j: (j, 0)),
            ],
            out_specs=pl.BlockSpec((2, _SUBLANES, _LANES), lambda j: (0, 0, 0)),
            compiler_params=pltpu.CompilerParams(
                dimension_semantics=("arbitrary",),
                vmem_limit_bytes=32 * 1024 * 1024,
            ),
        )(p2, g2)

        sums = jnp.sum(partials, axis=(1, 2))         # (2,) tiny epilogue reduce
        loss_sum = loss_sum + sums[0]
        num_pos = num_pos + sums[1]

    if rem:
        t_loss, t_pos = _tail_sums(p[n_main:], g[n_main:], alpha, beta, eps)
        loss_sum = loss_sum + t_loss
        num_pos = num_pos + t_pos

    # if preds[pos_inds].nelement() == 0: loss = -neg_loss
    # else:                               loss = -(pos_loss + neg_loss) / num_pos
    # pos_loss == 0 whenever num_pos == 0, so -loss_sum also covers branch 1.
    return jnp.where(num_pos == 0.0, -loss_sum,
                     -loss_sum / jnp.maximum(num_pos, 1.0))


def _center_loss_ref(preds, gt, *, alpha=0, beta=4, eps=1e-8):
    """Pure-JAX reference mirroring the PyTorch forward exactly."""
    p = preds.reshape(-1).astype(jnp.float32)
    g = gt.reshape(-1).astype(jnp.float32)
    pos = g == 1.0
    neg = g < 1.0
    num_pos = jnp.sum(pos.astype(jnp.float32))
    pos_loss = jnp.sum(
        jnp.where(pos, jnp.log(p + eps) * jnp.power(1.0 - p, float(alpha)), 0.0)
    )
    neg_loss = jnp.sum(
        jnp.where(
            neg,
            jnp.log(1.0 - p + eps)
            * jnp.power(p, float(alpha))
            * jnp.power(1.0 - g, float(beta)),
            0.0,
        )
    )
    return jnp.where(num_pos == 0.0, -neg_loss, -(pos_loss + neg_loss) / num_pos)


if __name__ == "__main__":
    key = jax.random.PRNGKey(0)

    def make_inputs(k, shape, pos_rate=0.97):
        k_p, k_g, k_m = jax.random.split(k, 3)
        preds = jax.random.uniform(k_p, shape, jnp.float32, 0.01, 0.99)
        gt_soft = jax.random.uniform(k_g, shape, jnp.float32, 0.0, 0.95)
        pos_mask = jax.random.uniform(k_m, shape) > pos_rate
        gt = jnp.where(pos_mask, 1.0, gt_soft)
        return preds, gt

    keys = jax.random.split(key, 4)

    # 1) Heatmap-shaped input (multiple of 1024 elements), default tiling.
    preds, gt = make_inputs(keys[0], (2, 4, 16, 16))
    out = jax.block_until_ready(center_loss(preds, gt))
    ref = _center_loss_ref(preds, gt)
    assert jnp.allclose(out, ref, rtol=1e-4, atol=1e-4), (out, ref)

    # 1b) Same inputs in bf16 (halves HBM traffic; kernel upcasts per tile).
    out_bf = jax.block_until_ready(
        center_loss(preds.astype(jnp.bfloat16), gt.astype(jnp.bfloat16)))
    ref_bf = _center_loss_ref(preds.astype(jnp.bfloat16), gt.astype(jnp.bfloat16))
    assert jnp.allclose(out_bf, ref_bf, rtol=5e-3, atol=5e-3), (out_bf, ref_bf)

    # 2) Ragged element count -> exercises the tiny pure-jnp tail epilogue.
    preds, gt = make_inputs(keys[1], (3, 5, 17, 19))
    out = jax.block_until_ready(center_loss(preds, gt))
    ref = _center_loss_ref(preds, gt)
    assert jnp.allclose(out, ref, rtol=1e-4, atol=1e-4), (out, ref)

    # 3) rows not a multiple of block_rows -> exercises the in-kernel
    #    last-block row mask (block_rows overridden small for testing).
    preds, gt = make_inputs(keys[2], (3, 1, 32, 32))
    out = jax.block_until_ready(center_loss(preds, gt, block_rows=16))
    ref = _center_loss_ref(preds, gt)
    assert jnp.allclose(out, ref, rtol=1e-4, atol=1e-4), (out, ref)

    # 4) No positives at all -> exercises the num_pos == 0 branch.
    k_p, k_g = jax.random.split(keys[3])
    preds = jax.random.uniform(k_p, (2, 2, 16, 16), jnp.float32, 0.01, 0.99)
    gt = jax.random.uniform(k_g, (2, 2, 16, 16), jnp.float32, 0.0, 0.9)
    out = jax.block_until_ready(center_loss(preds, gt))
    ref = _center_loss_ref(preds, gt)
    assert jnp.allclose(out, ref, rtol=1e-4, atol=1e-4), (out, ref)

    print("KERNEL_OK")
</pallas_src>

<mosaic_0001>
module attributes {stable_mosaic.version = 11 : i64} {
  func.func @_center_loss_kernel(%arg0: i32, %arg1: memref<16x128xf32, #tpu.memory_space<vmem>>, %arg2: memref<16x128xf32, #tpu.memory_space<vmem>>, %arg3: memref<2x8x128xf32, #tpu.memory_space<vmem>>) attributes {dimension_semantics = [#tpu.dimension_semantics<arbitrary>], iteration_bounds = array<i64: 1>, scalar_prefetch = 0 : i64, scratch_operands = 0 : i64, tpu.core_type = #tpu.core_type<tc>, window_params = [{transform_indices = @transform_0, window_bounds = array<i64: 16, 128>}, {transform_indices = @transform_1, window_bounds = array<i64: 16, 128>}, {pipeline_mode = #tpu.pipeline_mode<synchronous>, transform_indices = @transform_2, window_bounds = array<i64: 2, 8, 128>}]} {
    %c0_i32 = arith.constant 0 : i32
    %0 = arith.cmpi eq, %arg0, %c0_i32 : i32
    %1 = arith.extui %0 : i1 to i32
    %c0_i32_0 = arith.constant 0 : i32
    %2 = arith.cmpi ne, %1, %c0_i32_0 : i32
    scf.if %2 {
      %cst_22 = arith.constant 0.000000e+00 : f32
      %41 = vector.broadcast %cst_22 : f32 to vector<2x8x128xf32>
      %c0_23 = arith.constant 0 : index
      %c0_24 = arith.constant 0 : index
      %c0_25 = arith.constant 0 : index
      %42 = vector.load %arg3[%c0_23, %c0_24, %c0_25] : memref<2x8x128xf32, #tpu.memory_space<vmem>>, vector<2x8x128xf32>
      tpu.vector_store %arg3[%c0_23, %c0_24, %c0_25], %41 {strides = array<i32>} : memref<2x8x128xf32, #tpu.memory_space<vmem>>, vector<2x8x128xf32>,
    } else {
    }
    %c0 = arith.constant 0 : index
    %c0_1 = arith.constant 0 : index
    %3 = vector.load %arg1[%c0, %c0_1] : memref<16x128xf32, #tpu.memory_space<vmem>>, vector<16x128xf32>
    %c0_2 = arith.constant 0 : index
    %c0_3 = arith.constant 0 : index
    %4 = vector.load %arg2[%c0_2, %c0_3] : memref<16x128xf32, #tpu.memory_space<vmem>>, vector<16x128xf32>
    %cst = arith.constant 1.000000e+00 : f32
    %5 = vector.broadcast %cst : f32 to vector<16x128xf32>
    %6 = arith.cmpf oeq, %4, %5 : vector<16x128xf32>
    %7 = arith.extui %6 : vector<16x128xi1> to vector<16x128xi32>
    %8 = arith.sitofp %7 : vector<16x128xi32> to vector<16x128xf32>
    %cst_4 = arith.constant 1.000000e+00 : f32
    %9 = vector.broadcast %cst_4 : f32 to vector<16x128xf32>
    %10 = arith.subf %9, %3 : vector<16x128xf32>
    %11 = arith.select %6, %3, %10 : vector<16x128xi1>, vector<16x128xf32>
    %cst_5 = arith.constant 9.99999993E-9 : f32
    %12 = vector.broadcast %cst_5 : f32 to vector<16x128xf32>
    %13 = arith.addf %11, %12 : vector<16x128xf32>
    %14 = math.log %13 : vector<16x128xf32>
    %cst_6 = arith.constant 1.000000e+00 : f32
    %15 = vector.broadcast %cst_6 : f32 to vector<16x128xf32>
    %16 = arith.cmpf olt, %4, %15 : vector<16x128xf32>
    %cst_7 = arith.constant 1.000000e+00 : f32
    %17 = vector.broadcast %cst_7 : f32 to vector<16x128xf32>
    %18 = arith.subf %17, %4 : vector<16x128xf32>
    %19 = arith.mulf %18, %18 : vector<16x128xf32>
    %20 = arith.mulf %19, %19 : vector<16x128xf32>
    %cst_8 = arith.constant 0.000000e+00 : f32
    %21 = vector.broadcast %cst_8 : f32 to vector<16x128xf32>
    %22 = arith.select %16, %20, %21 : vector<16x128xi1>, vector<16x128xf32>
    %c0_9 = arith.constant 0 : index
    %c0_10 = arith.constant 0 : index
    %c0_11 = arith.constant 0 : index
    %23 = vector.load %arg3[%c0_9, %c0_10, %c0_11] : memref<2x8x128xf32, #tpu.memory_space<vmem>>, vector<1x8x128xf32>
    %24 = vector.shape_cast %23 : vector<1x8x128xf32> to vector<8x128xf32>
    %25 = arith.addf %8, %22 : vector<16x128xf32>
    %26 = arith.mulf %14, %25 : vector<16x128xf32>
    %27 = vector.shape_cast %26 : vector<16x128xf32> to vector<2x8x128xf32>
    %cst_12 = arith.constant dense<0.000000e+00> : vector<8x128xf32>
    %28 = vector.multi_reduction <add>, %27, %cst_12 [0] : vector<2x8x128xf32> to vector<8x128xf32>
    %29 = arith.addf %24, %28 : vector<8x128xf32>
    %c0_13 = arith.constant 0 : index
    %c0_14 = arith.constant 0 : index
    %c0_15 = arith.constant 0 : index
    %30 = vector.load %arg3[%c0_13, %c0_14, %c0_15] : memref<2x8x128xf32, #tpu.memory_space<vmem>>, vector<1x8x128xf32>
    %31 = vector.shape_cast %30 : vector<1x8x128xf32> to vector<8x128xf32>
    %32 = vector.shape_cast %29 : vector<8x128xf32> to vector<1x8x128xf32>
    tpu.vector_store %arg3[%c0_13, %c0_14, %c0_15], %32 {strides = array<i32>} : memref<2x8x128xf32, #tpu.memory_space<vmem>>, vector<1x8x128xf32>,
    %c1 = arith.constant 1 : index
    %c0_16 = arith.constant 0 : index
    %c0_17 = arith.constant 0 : index
    %33 = vector.load %arg3[%c1, %c0_16, %c0_17] : memref<2x8x128xf32, #tpu.memory_space<vmem>>, vector<1x8x128xf32>
    %34 = vector.shape_cast %33 : vector<1x8x128xf32> to vector<8x128xf32>
    %35 = vector.shape_cast %8 : vector<16x128xf32> to vector<2x8x128xf32>
    %cst_18 = arith.constant dense<0.000000e+00> : vector<8x128xf32>
    %36 = vector.multi_reduction <add>, %35, %cst_18 [0] : vector<2x8x128xf32> to vector<8x128xf32>
    %37 = arith.addf %34, %36 : vector<8x128xf32>
    %c1_19 = arith.constant 1 : index
    %c0_20 = arith.constant 0 : index
    %c0_21 = arith.constant 0 : index
    %38 = vector.load %arg3[%c1_19, %c0_20, %c0_21] : memref<2x8x128xf32, #tpu.memory_space<vmem>>, vector<1x8x128xf32>
    %39 = vector.shape_cast %38 : vector<1x8x128xf32> to vector<8x128xf32>
    %40 = vector.shape_cast %37 : vector<8x128xf32> to vector<1x8x128xf32>
    tpu.vector_store %arg3[%c1_19, %c0_20, %c0_21], %40 {strides = array<i32>} : memref<2x8x128xf32, #tpu.memory_space<vmem>>, vector<1x8x128xf32>,
    return
  }
  func.func @transform_0(%arg0: i32) -> (i32, i32) {
    %c0_i32 = arith.constant 0 : i32
    %c0_i32_0 = arith.constant 0 : i32
    return %arg0, %c0_i32 : i32, i32
  }
  func.func @transform_1(%arg0: i32) -> (i32, i32) {
    %c0_i32 = arith.constant 0 : i32
    %c0_i32_0 = arith.constant 0 : i32
    return %arg0, %c0_i32 : i32, i32
  }
  func.func @transform_2(%arg0: i32) -> (i32, i32, i32) {
    %c0_i32 = arith.constant 0 : i32
    %c0_i32_0 = arith.constant 0 : i32
    %c0_i32_1 = arith.constant 0 : i32
    %c0_i32_2 = arith.constant 0 : i32
    return %c0_i32, %c0_i32_0, %c0_i32_1 : i32, i32, i32
  }
}

</mosaic_0001>

<bundles_post_ra>
// kernel: tpu_custom_call.1
= control target key start
LH: loop header
LB: loop body
LE: loop exit
PB: predicated region body
PF: predicated region fallthrough
CT: control target
= control target key end

     0   :  { %7 = vsyncpa [#allocation3], 0  ;;  %s257_s0 = inlined_call_operand.hbm [shape: f32[16,128], index: 0, kind: input, shape index: {}]   ;;  %s258_s1 = inlined_call_operand.hbm [shape: f32[16,128], index: 1, kind: input, shape index: {}]   ;;  %s259_s2 = inlined_call_operand.hbm [shape: f32[2,8,128], index: 2, kind: output, shape index: {}]  }
   0x1   :  { %8 = vsyncpa [#allocation6], 0 }
   0x2   :  { %9 = vsyncpa [#allocation4], 0  ;;  %s191_s9 = smov [#allocation2]   ;;  %s119_s13 = scalar_lea.hbm %s257_s0, 256 }
   0x3   :  { %s15_s10 = sshll.u32 %s191_s9, 4  ;;  %p120_p0 = scmp.ne.s32.totalorder %s257_s0, %s119_s13  ;;  %s16_s10 = int_to_ptr.vmem [resolvable:$true] %s15_s10 }
   0x4   :  { %p123_p1 = scmp.lt.u32.totalorder %s119_s13, %s257_s0 }
   0x6   :  { %p125_p2 = pnand %p123_p1, %p120_p0 }
   0x8   :  { %128 = shalt.err (!%p125_p2)
}
   0x9   :  { %s129_s18 = scalar_lea.vmem %s16_s10, 256  ;;  %p134_p4 = scmp.lt.s32.totalorder %s16_s10, %s16_s10 }
   0xa   :  { %p130_p3 = scmp.ne.s32.totalorder %s16_s10, %s129_s18  ;;  %p135_p5 = scmp.lt.s32.totalorder %s129_s18, %s129_s18 }
   0xc   :  { %p136_p6 = por %p135_p5, %p134_p4 }
   0xe   :  { %p137_p7 = pnand %p136_p6, %p130_p3 }
  0x10   :  { %140 = shalt.err (!%p137_p7)
}
  0x11   :  { %s192_s19 = smov 128   ;;  %s193_s20 = smov 8  }
  0x12   :  { %21 = dma.hbm_to_vmem [thread:$0]  %s257_s0, 256, %s16_s10, [#allocation3], %s192_s19, %s192_s19, %s193_s20  }
  0x13   :  { %s194_s23 = smov [#allocation5]   ;;  %s141_s27 = scalar_lea.hbm %s258_s1, 256 }
  0x14   :  { %s27_s24 = sshll.u32 %s194_s23, 4  ;;  %p142_p8 = scmp.ne.s32.totalorder %s258_s1, %s141_s27  ;;  %s28_s24 = int_to_ptr.vmem [resolvable:$true] %s27_s24 }
  0x15   :  { %p145_p9 = scmp.lt.u32.totalorder %s141_s27, %s258_s1 }
  0x17   :  { %p147_p10 = pnand %p145_p9, %p142_p8 }
  0x19   :  { %150 = shalt.err (!%p147_p10)
}
  0x1a   :  { %s151_s4 = scalar_lea.vmem %s28_s24, 256  ;;  %p156_p12 = scmp.lt.s32.totalorder %s28_s24, %s28_s24 }
  0x1b   :  { %p152_p11 = scmp.ne.s32.totalorder %s28_s24, %s151_s4  ;;  %p157_p13 = scmp.lt.s32.totalorder %s151_s4, %s151_s4 }
  0x1d   :  { %p158_p0 = por %p157_p13, %p156_p12 }
  0x1f   :  { %p159_p1 = pnand %p158_p0, %p152_p11 }
  0x21   :  { %162 = shalt.err (!%p159_p1)
}
  0x22   :  { %33 = dma.hbm_to_vmem [thread:$0]  %s258_s1, 256, %s28_s24, [#allocation6], %s192_s19, %s192_s19, %s193_s20  }
  0x23   :  { %185 = dma.done.wait [#allocation3], 256  }
  0x24   :  { %186 = vsyncadd [#allocation3], 4294967040 }
  0x25   :  { %187 = dma.done.wait [#allocation6], 256  }
  0x26   :  { %188 = vsyncadd [#allocation6], 4294967040  ;;  %v46_v0 = vld [vmem:[#allocation2] sm:$0xff]  ;;  %v47_v1 = vld [vmem:[#allocation2 + $0x8] sm:$0xff]  ;;  %v195_v6 = vmov 0.0   ;;  %s196_s1 = smov [#allocation7]  }
  0x27   :  { %v48_v2 = vld [vmem:[#allocation5] sm:$0xff]  ;;  %v49_v3 = vld [vmem:[#allocation5 + $0x8] sm:$0xff]  ;;  %v56_v4 = vsub.f32 1.0, %v46_v0  ;;  %v57_v5 = vsub.f32 1.0, %v47_v1  ;;  %s94_s6 = sshll.u32 %s196_s1, 4  ;;  %s95_s6 = int_to_ptr.vmem [resolvable:$true] %s94_s6 }
  0x28   :  { %vm50_vm0 = vcmp.eq.f32.partialorder %v48_v2, 1.0  ;;  %vm51_vm1 = vcmp.eq.f32.partialorder %v49_v3, 1.0  ;;  %v68_v8 = vsub.f32 1.0, %v48_v2  ;;  %v69_v12 = vsub.f32 1.0, %v49_v3  ;;  %s163_s7 = scalar_lea.vmem %s95_s6, 256  ;;  %p168_p3 = scmp.lt.s32.totalorder %s95_s6, %s95_s6 }
  0x29   :  { %v107_v7 = vsel %vm50_vm0, 1.0, %v195_v6  ;;  %v108_v9 = vsel %vm51_vm1, 1.0, %v195_v6  ;;  %v58_v10 = vsel %vm50_vm0, %v46_v0, %v56_v4  ;;  %v59_v11 = vsel %vm51_vm1, %v47_v1, %v57_v5  ;;  %p164_p2 = scmp.ne.s32.totalorder %s95_s6, %s163_s7  ;;  %p169_p4 = scmp.lt.s32.totalorder %s163_s7, %s163_s7 }
  0x2a   :  { %v60_v13 = vadd.f32 1e-08, %v58_v10  ;;  %v61_v14 = vadd.f32 1e-08, %v59_v11  ;;  %v70_v15 = vmul.f32 %v68_v8, %v68_v8  ;;  %v86_v16 = vadd.f32 %v108_v9, %v107_v7 }
  0x2b   :  { %v71_v17 = vmul.f32 %v69_v12, %v69_v12  ;;  %vm66_vm2 = vcmp.lt.f32.partialorder %v48_v2, 1.0  ;;  %vm67_vm3 = vcmp.lt.f32.partialorder %v49_v3, 1.0  ;;  %p170_p5 = por %p169_p4, %p168_p3 }
  0x2c   :  { %115 = vlog2.f32 %v60_v13  ;;  %v72_v18 = vmul.f32 %v70_v15, %v70_v15  ;;  %88 = vst [vmem:[#allocation7 + $0x8] sm:$0xff] %v86_v16 }
  0x2d   :  { %117 = vlog2.f32 %v61_v14  ;;  %v73_v19 = vmul.f32 %v71_v17, %v71_v17  ;;  %p171_p6 = pnand %p170_p5, %p164_p2 }
  0x2e   :  { %v74_v20 = vsel %vm66_vm2, %v72_v18, 0.0 }
  0x2f   :  { %v75_v21 = vsel %vm67_vm3, %v73_v19, 0.0  ;;  %v77_v22 = vadd.f32 %v107_v7, %v74_v20 }
  0x30   :  { %v78_v24 = vadd.f32 %v108_v9, %v75_v21 }
  0x36   :  { %v116_v23 = vpop.eup %115 }
  0x37   :  { %v118_v25 = vpop.eup %117  ;;  %v63_v26 = vmul.f32 0.6931472, %v116_v23 }
  0x38   :  { %v65_v27 = vmul.f32 0.6931472, %v118_v25 }
  0x39   :  { %v79_v28 = vmul.f32 %v77_v22, %v63_v26 }
  0x3a   :  { %v80_v29 = vmul.f32 %v78_v24, %v65_v27 }
  0x3c   :  { %v81_v30 = vadd.f32 %v80_v29, %v79_v28 }
  0x3e   :  { %83 = vst [vmem:[#allocation7] sm:$0xff] %v81_v30 }
  0x3f   :  { %174 = shalt.err (!%p171_p6)
}
  0x40   :  { %s175_s10 = scalar_lea.hbm %s259_s2, 256 }
  0x41   :  { %p176_p7 = scmp.ne.s32.totalorder %s259_s2, %s175_s10  ;;  %p179_p8 = scmp.lt.u32.totalorder %s175_s10, %s259_s2 }
  0x43   :  { %p181_p9 = pnand %p179_p8, %p176_p7 }
  0x45   :  { %184 = shalt.err (!%p181_p9)
}
  0x46   :  { %100 = dma.vmem_to_hbm [thread:$0]  %s95_s6, 256, %s259_s2, [#allocation4], %s192_s19, %s192_s19, %s193_s20  }
  0x47   :  { %189 = dma.done.wait [#allocation4], 256  }
  0x48   :  { %190 = vsyncadd [#allocation4], 4294967040 }
  0x49   :  { %104 = vsyncpa [#allocation3], 1 }
  0x4a   :  { %105 = vsyncpa [#allocation6], 1 }
  0x4b   :  { %106 = vsyncpa [#allocation4], 1 }

</bundles_post_ra>
